<compile_context>
chip_gen: v6e
topology: v6e:2x2x1
jax: 0.10.0
libtpu: 0.0.40
codegen_flags: <defaults>
</compile_context>

<pallas_src>
import jax
import jax.numpy as jnp
from jax.experimental import pallas as pl
from jax.experimental.pallas import tpu as pltpu


_LANES = 128          # vreg lane width
_MAX_TILE_ROWS = 512  # rows per grid step (multiple of 8 sublanes)


# ---------------------------------------------------------------------------
# Kernel bodies (elementwise, operate on one (tile_rows, 128) VMEM block).
# bias_ref lives in SMEM as a (1,) f32 scalar.
# ---------------------------------------------------------------------------
def _kernel_bias_sigmoid(bias_ref, x_ref, o_ref):
    v = x_ref[...].astype(jnp.float32) + bias_ref[0]
    o_ref[...] = jax.nn.sigmoid(v).astype(o_ref.dtype)


def _kernel_bias_only(bias_ref, x_ref, o_ref):
    v = x_ref[...].astype(jnp.float32) + bias_ref[0]
    o_ref[...] = v.astype(o_ref.dtype)


def _kernel_sigmoid_only(x_ref, o_ref):
    v = x_ref[...].astype(jnp.float32)
    o_ref[...] = jax.nn.sigmoid(v).astype(o_ref.dtype)


def _round_up(n, m):
    return ((n + m - 1) // m) * m


# ---------------------------------------------------------------------------
# Wrapper
# ---------------------------------------------------------------------------
def prediction_layer(x, bias=None, *, task="binary", use_bias=True):
    """Pallas implementation of DIEN PredictionLayer.forward."""
    if task not in ("binary", "multiclass", "regression"):
        raise ValueError("task must be binary,multiclass or regression")

    do_sigmoid = task == "binary"

    # Pure identity: nothing to compute, no kernel launch.
    if not use_bias and not do_sigmoid:
        return x

    orig_shape = x.shape
    orig_dtype = x.dtype
    n = x.size

    # ---- lane-dense slab: flatten + zero-pad to (rows_padded, 128) ----------
    rows = max(1, pl.cdiv(n, _LANES))
    if rows <= _MAX_TILE_ROWS:
        tile_rows = _round_up(rows, 8)
        rows_padded = tile_rows
    else:
        tile_rows = _MAX_TILE_ROWS
        rows_padded = _round_up(rows, _MAX_TILE_ROWS)

    n_padded = rows_padded * _LANES
    x_flat = x.reshape(-1)
    if n_padded != n:
        x_flat = jnp.pad(x_flat, (0, n_padded - n))
    x_slab = x_flat.reshape(rows_padded, _LANES)

    grid = (rows_padded // tile_rows,)
    slab_spec = pl.BlockSpec((tile_rows, _LANES), lambda i: (i, 0))
    out_shape = jax.ShapeDtypeStruct((rows_padded, _LANES), orig_dtype)

    compiler_params = pltpu.CompilerParams(
        dimension_semantics=("parallel",),          # shard tiles across TCs (v7x)
        vmem_limit_bytes=32 * 1024 * 1024,          # fits v5e/v6e/v7x scoped VMEM
    )

    if use_bias:
        assert bias is not None
        bias_f32 = jnp.asarray(bias, dtype=jnp.float32).reshape((1,))
        kernel = _kernel_bias_sigmoid if do_sigmoid else _kernel_bias_only
        out_slab = pl.pallas_call(
            kernel,
            out_shape=out_shape,
            grid=grid,
            in_specs=[
                pl.BlockSpec(memory_space=pltpu.SMEM),  # scalar bias
                slab_spec,
            ],
            out_specs=slab_spec,
            input_output_aliases={1: 0},  # reuse the (intermediate) slab buffer
            compiler_params=compiler_params,
        )(bias_f32, x_slab)
    else:
        out_slab = pl.pallas_call(
            _kernel_sigmoid_only,
            out_shape=out_shape,
            grid=grid,
            in_specs=[slab_spec],
            out_specs=slab_spec,
            input_output_aliases={0: 0},
            compiler_params=compiler_params,
        )(x_slab)

    # Drop the pad lanes (they only ever held sigmoid(bias) garbage) and
    # restore the original shape.
    return out_slab.reshape(-1)[:n].reshape(orig_shape)


if __name__ == "__main__":
    key = jax.random.PRNGKey(0)

    # DIEN feeds the final dense logit of shape (batch, 1) into PredictionLayer.
    batch = 8
    x = jax.random.normal(key, (batch, 1), dtype=jnp.float32)

    # Parameter init matches nn.Parameter(torch.zeros((1,)))
    bias = jnp.zeros((1,), dtype=jnp.float32)

    # Reference computed BEFORE the kernel call (kernel aliases an intermediate
    # buffer; computing the reference first keeps the check independent).
    ref = jax.nn.sigmoid(x + bias)

    out = prediction_layer(x, bias, task="binary", use_bias=True)
    out = jax.block_until_ready(out)

    assert out.shape == x.shape and out.dtype == x.dtype
    assert jnp.allclose(out, ref, atol=1e-6, rtol=1e-6)

    # Also exercise the no-sigmoid (regression) path.
    out_reg = jax.block_until_ready(
        prediction_layer(x, bias, task="regression", use_bias=True)
    )
    assert jnp.allclose(out_reg, x + bias, atol=1e-6, rtol=1e-6)

    print("KERNEL_OK")
</pallas_src>

<mosaic_0001>
module attributes {stable_mosaic.version = 11 : i64} {
  func.func @_kernel_bias_sigmoid(%arg0: i32, %arg1: memref<1xf32, #tpu.memory_space<smem>>, %arg2: memref<8x128xf32, #tpu.memory_space<vmem>>, %arg3: memref<8x128xf32, #tpu.memory_space<vmem>>) attributes {dimension_semantics = [#tpu.dimension_semantics<parallel>], iteration_bounds = array<i64: 1>, scalar_prefetch = 0 : i64, scratch_operands = 0 : i64, tpu.core_type = #tpu.core_type<tc>, window_params = [{transform_indices = @transform_0, window_bounds = array<i64: 1>}, {transform_indices = @transform_1, window_bounds = array<i64: 8, 128>}, {transform_indices = @transform_2, window_bounds = array<i64: 8, 128>}]} {
    %c0 = arith.constant 0 : index
    %c0_0 = arith.constant 0 : index
    %0 = vector.load %arg2[%c0, %c0_0] : memref<8x128xf32, #tpu.memory_space<vmem>>, vector<8x128xf32>
    %c0_1 = arith.constant 0 : index
    %1 = memref.load %arg1[%c0_1] : memref<1xf32, #tpu.memory_space<smem>>
    %2 = vector.broadcast %1 : f32 to vector<8x128xf32>
    %3 = arith.addf %0, %2 : vector<8x128xf32>
    %4 = arith.negf %3 : vector<8x128xf32>
    %5 = math.exp %4 : vector<8x128xf32>
    %cst = arith.constant 1.000000e+00 : f32
    %6 = vector.broadcast %cst : f32 to vector<8x128xf32>
    %7 = arith.addf %6, %5 : vector<8x128xf32>
    %8 = arith.divf %6, %7 : vector<8x128xf32>
    %c0_2 = arith.constant 0 : index
    %c0_3 = arith.constant 0 : index
    %9 = vector.load %arg3[%c0_2, %c0_3] : memref<8x128xf32, #tpu.memory_space<vmem>>, vector<8x128xf32>
    tpu.vector_store %arg3[%c0_2, %c0_3], %8 {strides = array<i32>} : memref<8x128xf32, #tpu.memory_space<vmem>>, vector<8x128xf32>,
    return
  }
  func.func @transform_0(%arg0: i32) -> i32 {
    %c0_i32 = arith.constant 0 : i32
    %c0_i32_0 = arith.constant 0 : i32
    return %c0_i32 : i32
  }
  func.func @transform_1(%arg0: i32) -> (i32, i32) {
    %c0_i32 = arith.constant 0 : i32
    %c0_i32_0 = arith.constant 0 : i32
    return %arg0, %c0_i32 : i32, i32
  }
  func.func @transform_2(%arg0: i32) -> (i32, i32) {
    %c0_i32 = arith.constant 0 : i32
    %c0_i32_0 = arith.constant 0 : i32
    return %arg0, %c0_i32 : i32, i32
  }
}

</mosaic_0001>

<bundles_post_ra>
// kernel: tpu_custom_call.1
= control target key start
LH: loop header
LB: loop body
LE: loop exit
PB: predicated region body
PF: predicated region fallthrough
CT: control target
= control target key end

     0   :  { %8 = vsyncpa [#allocation4], 0  ;;  %s128_s0 = inlined_call_operand.<no memory space> [shape: f32[1], index: 0, kind: input, shape index: {}]   ;;  %s129_s1 = inlined_call_operand.hbm [shape: f32[8,128], index: 1, kind: input, shape index: {}, may-alias: {1,2}]   ;;  %s130_s2 = inlined_call_operand.hbm [shape: f32[8,128], index: 2, kind: output, shape index: {}, may-alias: {1,2}]  }
   0x1   :  { %9 = vsyncpa [#allocation5], 0  ;;  %s102_s9 = smov [#allocation3]  }
   0x2   :  { %s18_s10 = sshll.u32 %s102_s9, 4  ;;  %s19_s10 = int_to_ptr.vmem [resolvable:$true] %s18_s10 }
   0x3   :  { %s66_s11 = scalar_lea.vmem %s19_s10, 128  ;;  %p71_p1 = scmp.lt.s32.totalorder %s19_s10, %s19_s10 }
   0x4   :  { %p67_p0 = scmp.ne.s32.totalorder %s19_s10, %s66_s11  ;;  %p72_p2 = scmp.lt.s32.totalorder %s66_s11, %s66_s11 }
   0x6   :  { %p73_p3 = por %p72_p2, %p71_p1 }
   0x8   :  { %p74_p4 = pnand %p73_p3, %p67_p0 }
   0xa   :  { %77 = shalt.err (!%p74_p4)
}
   0xb   :  { %21 = dma.hbm_to_vmem [thread:$0]  %s129_s1, 128, %s19_s10, [#allocation4]  }
   0xc   :  { %98 = dma.done.wait [#allocation4], 128  }
   0xd   :  { %99 = vsyncadd [#allocation4], 4294967168  ;;  %v27_v0 = vstv %s128_s0  ;;  %v25_v1 = vld [vmem:[#allocation3] sm:$0xff]  ;;  %s103_s16 = smov [#allocation6]  }
   0xe   :  { %v28_v2 = vadd.f32 %v27_v0, %v25_v1  ;;  %s42_s17 = sshll.u32 %s103_s16, 4  ;;  %s43_s17 = int_to_ptr.vmem [resolvable:$true] %s42_s17 }
   0xf   :  { %s78_s18 = scalar_lea.vmem %s43_s17, 128  ;;  %p83_p6 = scmp.lt.s32.totalorder %s43_s17, %s43_s17 }
  0x10   :  { %v51_v3 = vmul.f32 -1.442695, %v28_v2  ;;  %p79_p5 = scmp.ne.s32.totalorder %s43_s17, %s78_s18  ;;  %p84_p7 = scmp.lt.s32.totalorder %s78_s18, %s78_s18 }
  0x12   :  { %54 = vpow2.f32 %v51_v3  ;;  %p85_p8 = por %p84_p7, %p83_p6 }
  0x14   :  { %p86_p9 = pnand %p85_p8, %p79_p5 }
  0x1f   :  { %v55_v4 = vpop.eup %54 }
  0x20   :  { %v32_v5 = vadd.f32 1.0, %v55_v4 }
  0x22   :  { %56 = vrcp.f32 %v32_v5 }
  0x2f   :  { %v57_v6 = vpop.eup %56 }
  0x30   :  { %35 = vst [vmem:[#allocation6] sm:$0xff] %v57_v6 }
  0x31   :  { %89 = shalt.err (!%p86_p9)
}
  0x32   :  { %45 = dma.vmem_to_hbm [thread:$0]  %s43_s17, 128, %s130_s2, [#allocation5]  }
  0x33   :  { %100 = dma.done.wait [#allocation5], 128  }
  0x34   :  { %101 = vsyncadd [#allocation5], 4294967168 }
  0x35   :  { %49 = vsyncpa [#allocation4], 1 }
  0x36   :  { %50 = vsyncpa [#allocation5], 1 }

</bundles_post_ra>
